<compile_context>
chip_gen: v6e
topology: v6e:2x2x1
jax: 0.10.0
libtpu: 0.0.40
codegen_flags: <defaults>
</compile_context>

<pallas_src>
import functools
import math

import jax
import jax.numpy as jnp
from jax.experimental import pallas as pl
from jax.experimental.pallas import tpu as pltpu


def make_positional_encoding(d_model: int, max_len: int, dtype=jnp.float32):
    """Deterministic buffer setup (plain-JAX glue, same math as __init__)."""
    position = jnp.arange(max_len, dtype=jnp.float32)[:, None]              # [max_len, 1]
    div_term = jnp.exp(
        jnp.arange(0, d_model, 2, dtype=jnp.float32) * (-math.log(10000.0) / d_model)
    )                                                                        # [d_model/2]
    pe = jnp.zeros((max_len, d_model), dtype=jnp.float32)
    pe = pe.at[:, 0::2].set(jnp.sin(position * div_term))
    pe = pe.at[:, 1::2].set(jnp.cos(position * div_term))
    return pe.astype(dtype)


def _tpu_generation_and_cores():
    """Best-effort chip detection; falls back to conservative defaults."""
    try:
        kind = jax.devices()[0].device_kind.lower()
    except Exception:
        return "unknown", 1
    if "v5" in kind:
        return "v5", 1
    if "v6" in kind:
        return "v6", 1
    if "v7" in kind:
        return "v7", 2          # 2 TensorCores per chip
    return "unknown", 1


def _pe_dropout_kernel(seed_ref, x_ref, pe_ref, o_ref, *, p, deterministic, compute_dtype):
    # x_ref: (rows_tile, BD), pe_ref: (1, BD) -> broadcast add over rows.
    # compute_dtype is bf16 on v6e/v7x for bf16 inputs (bf16 VPU), f32 otherwise.
    y = x_ref[...].astype(compute_dtype) + pe_ref[...].astype(compute_dtype)
    if deterministic or p == 0.0:
        o_ref[...] = y.astype(o_ref.dtype)
    else:
        keep_prob = 1.0 - p
        # Mix the grid position into the seed so each row tile gets a distinct mask.
        pltpu.prng_seed(seed_ref[0], pl.program_id(0))
        bits = pltpu.bitcast(pltpu.prng_random_bits(y.shape), jnp.uint32)
        # Clamp so keep_prob -> 1 does not wrap uint32 to 0 (which would drop everything).
        thresh_val = min(max(int(keep_prob * (2.0 ** 32)), 0), 2 ** 32 - 1)
        keep = bits < jnp.uint32(thresh_val)
        scale = jnp.asarray(1.0 / keep_prob, dtype=compute_dtype)
        # TODO(synk): on v7x bf16 training, generate half as many u32 random words and
        # split them into 2x16-bit thresholds to keep PRNG bit generation off the
        # critical path (neutral on v5e/v6e, so not done here).
        o_ref[...] = jnp.where(keep, y * scale, jnp.zeros_like(y)).astype(o_ref.dtype)


def positional_encoding_forward(x, pe, *, p: float = 0.1,
                                deterministic: bool = True, seed: int = 0,
                                rows_tile: int | None = None):
    """Forward pass: dropout(x + pe[:seq_len]).

    x : [seq_len, batch, d_model]   (requires batch == seq_len, exactly as the
                                     reference module's broadcast does)
    pe: [max_len, d_model] buffer
    `deterministic=True` reproduces eval-mode (dropout = identity); with
    `deterministic=False` dropout uses the in-kernel TPU PRNG (inverted dropout,
    keep-prob scaling).
    """
    S, B, D = x.shape
    if S != B:
        raise ValueError(
            "Reference module's `x + pe[:S]` broadcast requires seq_len == batch "
            f"(got S={S}, B={B})."
        )
    BD = B * D
    itemsize = jnp.dtype(x.dtype).itemsize
    # Sublane packing per dtype: 8 for 32-bit, 16 for 16-bit, 32 for 8-bit.
    sub = {4: 8, 2: 16, 1: 32}.get(itemsize, 8)

    gen, num_cores = _tpu_generation_and_cores()
    # Native bf16 math on v6e/v7x; keep the f32 path on v5e (no bf16 VPU/EUP) and
    # for f32 inputs.
    if x.dtype == jnp.bfloat16 and gen in ("v6", "v7"):
        compute_dtype = jnp.bfloat16
    else:
        compute_dtype = jnp.float32

    # Lane-dense slab: trailing dims are contiguous, so this reshape is free.
    x2 = x.reshape(S, BD)
    # out[s, b, d] = x[s, b, d] + pe[b, d]  =>  pe collapses to one [1, B*D] row.
    pe_row = pe[:B].astype(x.dtype).reshape(1, BD)

    # Keep every output store a full unmasked vst: pad the lane dim to a multiple
    # of 128 when needed (no-op for 128-aligned B*D).
    BD_pad = ((BD + 127) // 128) * 128
    if BD_pad != BD:
        x2 = jnp.pad(x2, ((0, 0), (0, BD_pad - BD)))
        pe_row = jnp.pad(pe_row, ((0, 0), (0, BD_pad - BD)))

    seed_arr = jnp.array([seed], dtype=jnp.int32)

    # Per-generation tile / scoped-VMEM budgets (2 in-bufs + 2 out-bufs live):
    #   v7x : 8 MiB tiles  -> ~32 MiB live, 48 MiB limit (64 MiB physical/TC)
    #   v5e/v6e: 12 MiB tiles -> ~48 MiB live, 96 MiB limit (128 MiB physical)
    if gen == "v7":
        tile_budget_bytes, vmem_limit = 8 * 1024 * 1024, 48 * 1024 * 1024
    elif gen in ("v5", "v6"):
        tile_budget_bytes, vmem_limit = 12 * 1024 * 1024, 96 * 1024 * 1024
    else:
        tile_budget_bytes, vmem_limit = 8 * 1024 * 1024, 48 * 1024 * 1024

    if rows_tile is None:
        rows_cap = max(sub, (tile_budget_bytes // max(1, BD_pad * itemsize)) // sub * sub)
        rows_tile = min(S, rows_cap)
        # dimension_semantics=("parallel",) only shards across v7x's 2 TensorCores if
        # the grid has >= 2 steps; split a single-tile grid in two (sublane-aligned).
        if num_cores >= 2 and rows_tile >= S and S > sub:
            half = -(-S // 2)
            rows_tile = min(rows_tile, max(sub, ((half + sub - 1) // sub) * sub))
    grid = (pl.cdiv(S, rows_tile),)

    kernel = functools.partial(_pe_dropout_kernel, p=p, deterministic=deterministic,
                               compute_dtype=compute_dtype)

    out2 = pl.pallas_call(
        kernel,
        out_shape=jax.ShapeDtypeStruct((S, BD_pad), x.dtype),
        grid_spec=pltpu.PrefetchScalarGridSpec(
            num_scalar_prefetch=1,                       # seed lives in SMEM
            grid=grid,
            in_specs=[
                pl.BlockSpec((rows_tile, BD_pad), lambda i, seed: (i, 0)),
                pl.BlockSpec((1, BD_pad), lambda i, seed: (0, 0)),   # same tiny row every step
            ],
            out_specs=pl.BlockSpec((rows_tile, BD_pad), lambda i, seed: (i, 0)),
        ),
        compiler_params=pltpu.CompilerParams(
            dimension_semantics=("parallel",),            # shards rows across v7x's 2 TCs
            vmem_limit_bytes=vmem_limit,
        ),
        # Alias the output onto the x slab (operand 1; the scalar-prefetch seed is
        # operand 0).  Each output tile depends only on the same-index x tile, so
        # in-place reuse is safe; avoids a second full-size HBM allocation when the
        # caller donates x.
        input_output_aliases={1: 0},
    )(seed_arr, x2, pe_row)

    if BD_pad != BD:
        out2 = out2[:, :BD]
    return out2.reshape(S, B, D)


if __name__ == "__main__":
    d_model = 32
    max_len = 64
    dropout_p = 0.1
    seq_len = 8
    batch = 8      # batch == seq_len so the module's (exact) broadcast is valid

    key = jax.random.PRNGKey(0)
    x = jax.random.normal(key, (seq_len, batch, d_model), dtype=jnp.float32)

    pe = make_positional_encoding(d_model, max_len, dtype=x.dtype)

    # Eval-mode (deterministic) pass — check against plain-JAX reference.
    out_eval = positional_encoding_forward(x, pe, p=dropout_p, deterministic=True)
    out_eval = jax.block_until_ready(out_eval)
    ref_eval = x + pe[:seq_len]                         # same broadcasting as torch
    assert out_eval.shape == x.shape and out_eval.dtype == x.dtype
    assert jnp.allclose(out_eval, ref_eval, atol=1e-6, rtol=1e-6)

    # Training-mode pass (in-kernel dropout via the TPU hardware PRNG).  The TPU
    # PRNG primitives have no CPU/interpret lowering, so only exercise this path
    # on a real TPU backend.
    # TODO(synk): dropout RNG stream cannot match torch's; keep-prob/scaling semantics do.
    if jax.default_backend() == "tpu":
        out_train = positional_encoding_forward(x, pe, p=dropout_p,
                                                deterministic=False, seed=1234)
        out_train = jax.block_until_ready(out_train)
        kept = out_train != 0.0
        # kept entries are scaled by 1/(1-p)
        assert jnp.allclose(jnp.where(kept, out_train, 0.0),
                            jnp.where(kept, ref_eval / (1.0 - dropout_p), 0.0),
                            atol=1e-5, rtol=1e-5)

    print("KERNEL_OK")
</pallas_src>

<mosaic_0001>
module attributes {stable_mosaic.version = 11 : i64} {
  func.func @_pe_dropout_kernel(%arg0: i32, %arg1: memref<1xi32, #tpu.memory_space<smem>>, %arg2: memref<8x256xf32, #tpu.memory_space<vmem>>, %arg3: memref<1x256xf32, #tpu.memory_space<vmem>>, %arg4: memref<8x256xf32, #tpu.memory_space<vmem>>) attributes {dimension_semantics = [#tpu.dimension_semantics<parallel>], iteration_bounds = array<i64: 1>, scalar_prefetch = 1 : i64, scratch_operands = 0 : i64, tpu.core_type = #tpu.core_type<tc>, window_params = [{transform_indices = @transform_0, window_bounds = array<i64: 8, 256>}, {pipeline_mode = #tpu.pipeline_mode<synchronous>, transform_indices = @transform_1, window_bounds = array<i64: 1, 256>}, {transform_indices = @transform_2, window_bounds = array<i64: 8, 256>}]} {
    %c0 = arith.constant 0 : index
    %c0_0 = arith.constant 0 : index
    %0 = vector.load %arg2[%c0, %c0_0] : memref<8x256xf32, #tpu.memory_space<vmem>>, vector<8x256xf32>
    %c0_1 = arith.constant 0 : index
    %c0_2 = arith.constant 0 : index
    %1 = vector.load %arg3[%c0_1, %c0_2] : memref<1x256xf32, #tpu.memory_space<vmem>>, vector<1x256xf32>
    %2 = vector.broadcast %1 : vector<1x256xf32> to vector<8x256xf32>
    %3 = arith.addf %0, %2 : vector<8x256xf32>
    %c0_3 = arith.constant 0 : index
    %c0_4 = arith.constant 0 : index
    %4 = vector.load %arg4[%c0_3, %c0_4] : memref<8x256xf32, #tpu.memory_space<vmem>>, vector<8x256xf32>
    tpu.vector_store %arg4[%c0_3, %c0_4], %3 {strides = array<i32>} : memref<8x256xf32, #tpu.memory_space<vmem>>, vector<8x256xf32>,
    return
  }
  func.func @transform_0(%arg0: i32, %arg1: memref<1xi32, #tpu.memory_space<smem>>) -> (i32, i32) {
    %c0_i32 = arith.constant 0 : i32
    %c0_i32_0 = arith.constant 0 : i32
    return %arg0, %c0_i32 : i32, i32
  }
  func.func @transform_1(%arg0: i32, %arg1: memref<1xi32, #tpu.memory_space<smem>>) -> (i32, i32) {
    %c0_i32 = arith.constant 0 : i32
    %c0_i32_0 = arith.constant 0 : i32
    %c0_i32_1 = arith.constant 0 : i32
    return %c0_i32, %c0_i32_0 : i32, i32
  }
  func.func @transform_2(%arg0: i32, %arg1: memref<1xi32, #tpu.memory_space<smem>>) -> (i32, i32) {
    %c0_i32 = arith.constant 0 : i32
    %c0_i32_0 = arith.constant 0 : i32
    return %arg0, %c0_i32 : i32, i32
  }
}

</mosaic_0001>

<bundles_post_ra>
// kernel: tpu_custom_call.1
= control target key start
LH: loop header
LB: loop body
LE: loop exit
PB: predicated region body
PF: predicated region fallthrough
CT: control target
= control target key end

     0   :  { %9 = vsyncpa [#allocation5], 0  ;;  %s136_s0 = inlined_call_operand.<no memory space> [shape: s32[1], index: 0, kind: input, shape index: {}]   ;;  %s137_s1 = inlined_call_operand.hbm [shape: f32[8,256], index: 1, kind: input, shape index: {}, may-alias: {1,3}]   ;;  %s138_s2 = inlined_call_operand.vmem [shape: f32[1,256], index: 2, kind: input, shape index: {}]   ;;  %s139_s3 = inlined_call_operand.hbm [shape: f32[8,256], index: 3, kind: output, shape index: {}, may-alias: {1,3}]  }
   0x1   :  { %10 = vsyncpa [#allocation6], 0  ;;  %s105_s12 = smov [#allocation4]  }
   0x2   :  { %s17_s13 = sshll.u32 %s105_s12, 4  ;;  %s18_s13 = int_to_ptr.vmem [resolvable:$true] %s17_s13 }
   0x3   :  { %s69_s14 = scalar_lea.vmem %s18_s13, 256  ;;  %p74_p1 = scmp.lt.s32.totalorder %s18_s13, %s18_s13 }
   0x4   :  { %p70_p0 = scmp.ne.s32.totalorder %s18_s13, %s69_s14  ;;  %p75_p2 = scmp.lt.s32.totalorder %s69_s14, %s69_s14 }
   0x6   :  { %p76_p3 = por %p75_p2, %p74_p1 }
   0x8   :  { %p77_p4 = pnand %p76_p3, %p70_p0 }
   0xa   :  { %80 = shalt.err (!%p77_p4)
}
   0xb   :  { %20 = dma.hbm_to_vmem [thread:$0]  %s137_s1, 256, %s18_s13, [#allocation5]  }
   0xc   :  { %101 = dma.done.wait [#allocation5], 256  }
   0xd   :  { %102 = vsyncadd [#allocation5], 4294967040  ;;  %v30_v0 = vlaneseq  ;;  %v26_v4 = vld [vmem:[#allocation4] sm:$0xff]  ;;  %v27_v6 = vld [vmem:[#allocation4 + $0x8] sm:$0xff]  ;;  %s106_s18 = smov [#allocation7]  }
   0xe   :  { %v28_v5 = vld [vmem:[%s138_s2] sm:$0x3]  ;;  %s50_s19 = sshll.u32 %s106_s18, 4  ;;  %s51_s19 = int_to_ptr.vmem [resolvable:$true] %s50_s19 }
   0xf   :  { %v31_v1 = vshrl.u32 %v30_v0, 7  ;;  %s81_s1 = scalar_lea.vmem %s51_s19, 256  ;;  %p86_p6 = scmp.lt.s32.totalorder %s51_s19, %s51_s19 }
  0x10   :  { %p82_p5 = scmp.ne.s32.totalorder %s51_s19, %s81_s1  ;;  %p87_p7 = scmp.lt.s32.totalorder %s81_s1, %s81_s1 }
  0x11   :  { %v32_v2 = vsub.s32 0, %v31_v1  ;;  %v36_v3 = vsub.s32 1, %v31_v1 }
  0x12   :  { %p88_p8 = por %p87_p7, %p86_p6 }
  0x13   :  { %v33_v7 = vrot.slane %v28_v5, %v32_v2  ;;  %v37_v8 = vrot.slane %v28_v5, %v36_v3 }
  0x14   :  { %p89_p9 = pnand %p88_p8, %p82_p5 }
  0x15   :  { %v40_v9 = vadd.f32 %v33_v7, %v26_v4  ;;  %v41_v10 = vadd.f32 %v37_v8, %v27_v6 }
  0x17   :  { %42 = vst [vmem:[#allocation7] sm:$0xff] %v40_v9  ;;  %43 = vst [vmem:[#allocation7 + $0x8] sm:$0xff] %v41_v10 }
  0x18   :  { %92 = shalt.err (!%p89_p9)
}
  0x19   :  { %53 = dma.vmem_to_hbm [thread:$0]  %s51_s19, 256, %s139_s3, [#allocation6]  }
  0x1a   :  { %103 = dma.done.wait [#allocation6], 256  }
  0x1b   :  { %104 = vsyncadd [#allocation6], 4294967040 }
  0x1c   :  { %57 = vsyncpa [#allocation5], 1 }
  0x1d   :  { %58 = vsyncpa [#allocation6], 1 }

</bundles_post_ra>
